<compile_context>
chip_gen: v7x
topology: tpu7x:2x2x1
jax: 0.10.0
libtpu: 0.0.40
codegen_flags: <defaults>
</compile_context>

<pallas_src>
import jax
import jax.numpy as jnp
from jax.experimental import pallas as pl
from jax.experimental.pallas import tpu as pltpu


def linear_kernel(x_ref, w_ref, b_ref, o_ref):
    # Whole-array blocks resident in VMEM:
    #   x (B, F) bf16, w (F, Opad) bf16, b (1, Opad) f32, o (B, Opad) f32.
    acc = jnp.dot(x_ref[...], w_ref[...], preferred_element_type=jnp.float32)
    o_ref[...] = (acc + b_ref[...]).astype(o_ref.dtype)


def classifier_forward(x, w, b):
    """y = x @ w + b  (equivalent to torch.nn.Linear(n_feature, n_output)).

    x: (B, F) float32
    w: (F, O) float32   (already transposed from torch's (O, F) layout)
    b: (1, O) float32
    Returns (B, O) float32.
    """
    B, F = x.shape
    F2, O = w.shape
    assert F == F2 and b.shape == (1, O)

    # Pad the output/lane dimension up to a multiple of 128 for lane-dense,
    # unmasked stores and clean MXU column tiles.
    O_pad = ((O + 127) // 128) * 128
    pad = O_pad - O
    if pad:
        w = jnp.pad(w, ((0, 0), (0, pad)))
        b = jnp.pad(b, ((0, 0), (0, pad)))

    # bf16 operands for the MXU; accumulation and bias stay f32.
    x_bf16 = x.astype(jnp.bfloat16)
    w_bf16 = w.astype(jnp.bfloat16)

    y_pad = pl.pallas_call(
        linear_kernel,
        out_shape=jax.ShapeDtypeStruct((B, O_pad), jnp.float32),
        in_specs=[
            pl.BlockSpec(memory_space=pltpu.MemorySpace.VMEM),
            pl.BlockSpec(memory_space=pltpu.MemorySpace.VMEM),
            pl.BlockSpec(memory_space=pltpu.MemorySpace.VMEM),
        ],
        out_specs=pl.BlockSpec(memory_space=pltpu.MemorySpace.VMEM),
    )(x_bf16, w_bf16, b)

    return y_pad[:, :O]


if __name__ == "__main__":
    n_feature, n_output = 512, 250
    batch = 8

    key = jax.random.PRNGKey(0)
    kx, kw, kb = jax.random.split(key, 3)

    # Deterministic parameter init (matches torch Linear's uniform bound 1/sqrt(fan_in)).
    bound = 1.0 / jnp.sqrt(jnp.float32(n_feature))
    w_torch = jax.random.uniform(kw, (n_output, n_feature), jnp.float32, -bound, bound)
    b_torch = jax.random.uniform(kb, (n_output,), jnp.float32, -bound, bound)

    x = jax.random.normal(kx, (batch, n_feature), jnp.float32)

    # Transpose weight once (glue) so the kernel does x @ W.
    w = jnp.asarray(w_torch.T)           # (F, O)
    b = jnp.asarray(b_torch)[None, :]    # (1, O)

    y = classifier_forward(x, w, b)
    jax.block_until_ready(y)

    assert y.shape == (batch, n_output)

    # Reference checks.
    #  1) Exact-path reference: same bf16 operands, f32 accumulate (tight tol).
    y_ref_bf16 = (
        jnp.dot(x.astype(jnp.bfloat16), w.astype(jnp.bfloat16),
                preferred_element_type=jnp.float32) + b
    )
    assert jnp.allclose(y, y_ref_bf16, atol=1e-4, rtol=1e-4)

    #  2) Full-f32 reference (torch.nn.Linear math), loose tol for bf16 inputs.
    y_ref_f32 = x @ w + b
    assert jnp.allclose(y, y_ref_f32, atol=2e-2, rtol=2e-2)

    print("KERNEL_OK")
</pallas_src>

<mosaic_0001>
module attributes {stable_mosaic.version = 11 : i64} {
  func.func @linear_kernel(%arg0: memref<8x512xbf16, #tpu.memory_space<vmem>>, %arg1: memref<512x256xbf16, #tpu.memory_space<vmem>>, %arg2: memref<1x256xf32, #tpu.memory_space<vmem>>, %arg3: memref<8x256xf32, #tpu.memory_space<vmem>>) attributes {dimension_semantics = [], scalar_prefetch = 0 : i64, scratch_operands = 0 : i64, tpu.core_type = #tpu.core_type<tc>} {
    %c0 = arith.constant 0 : index
    %c0_0 = arith.constant 0 : index
    %0 = vector.load %arg0[%c0, %c0_0] : memref<8x512xbf16, #tpu.memory_space<vmem>>, vector<8x512xbf16>
    %c0_1 = arith.constant 0 : index
    %c0_2 = arith.constant 0 : index
    %1 = vector.load %arg1[%c0_1, %c0_2] : memref<512x256xbf16, #tpu.memory_space<vmem>>, vector<512x256xbf16>
    %cst = arith.constant dense<0.000000e+00> : vector<8x256xf32>
    %2 = tpu.matmul %0, %1, %cst {dimension_numbers = #tpu.dot_dimension_numbers<[1], [0], [0], [1], [0, 0, 1, 1], [], []>} : vector<8x512xbf16>, vector<512x256xbf16>, vector<8x256xf32> -> vector<8x256xf32>
    %c0_3 = arith.constant 0 : index
    %c0_4 = arith.constant 0 : index
    %3 = vector.load %arg2[%c0_3, %c0_4] : memref<1x256xf32, #tpu.memory_space<vmem>>, vector<1x256xf32>
    %4 = vector.broadcast %3 : vector<1x256xf32> to vector<8x256xf32>
    %5 = arith.addf %2, %4 : vector<8x256xf32>
    %c0_5 = arith.constant 0 : index
    %c0_6 = arith.constant 0 : index
    %6 = vector.load %arg3[%c0_5, %c0_6] : memref<8x256xf32, #tpu.memory_space<vmem>>, vector<8x256xf32>
    tpu.vector_store %arg3[%c0_5, %c0_6], %5 {strides = array<i32>} : memref<8x256xf32, #tpu.memory_space<vmem>>, vector<8x256xf32>,
    return
  }
}

</mosaic_0001>

<bundles_post_ra>
// kernel: tpu_custom_call.1
= control target key start
LH: loop header
LB: loop body
LE: loop exit
PB: predicated region body
PF: predicated region fallthrough
CT: control target
= control target key end

     0   :  { %8 = vsyncpa [#allocation3], 0  ;;  %s873_s0 = inlined_call_operand.hbm [shape: bf16[8,512], index: 0, kind: input, shape index: {}]   ;;  %s874_s1 = inlined_call_operand.hbm [shape: bf16[512,256], index: 1, kind: input, shape index: {}]   ;;  %s875_s2 = inlined_call_operand.vmem [shape: f32[1,256], index: 2, kind: input, shape index: {}]   ;;  %s876_s3 = inlined_call_operand.hbm [shape: f32[8,256], index: 3, kind: output, shape index: {}]  }
   0x1   :  { %9 = vsyncpa [#allocation6], 0 }
   0x2   :  { %10 = vsyncpa [#allocation4], 0  ;;  %s802_s12 = smov [#allocation2]   ;;  %s803_s14 = smov [#allocation5]  }
   0x3   :  { %s17_s13 = sshll.u32 %s802_s12, 4  ;;  %s26_s15 = sshll.u32 %s803_s14, 4  ;;  %s18_s13 = int_to_ptr.vmem [resolvable:$true] %s17_s13  ;;  %s827_s15 = int_to_ptr.vmem [resolvable:$true] %s26_s15 }
   0x4   :  { %s730_s18 = scalar_lea.hbm %s873_s0, 256 }
   0x5   :  { %p731_p0 = scmp.ne.s32.totalorder %s873_s0, %s730_s18  ;;  %p734_p1 = scmp.lt.u32.totalorder %s730_s18, %s873_s0 }
   0x7   :  { %p736_p2 = pnand %p734_p1, %p731_p0 }
   0x9   :  { %739 = shalt.err (!%p736_p2)
}
   0xa   :  { %s740_s23 = scalar_lea.vmem %s18_s13, 256  ;;  %p745_p4 = scmp.lt.s32.totalorder %s18_s13, %s18_s13 }
   0xb   :  { %p741_p3 = scmp.ne.s32.totalorder %s18_s13, %s740_s23  ;;  %p746_p5 = scmp.lt.s32.totalorder %s740_s23, %s740_s23 }
   0xd   :  { %p747_p6 = por %p746_p5, %p745_p4 }
   0xf   :  { %p748_p7 = pnand %p747_p6, %p741_p3 }
  0x11   :  { %751 = shalt.err (!%p748_p7)
}
  0x12   :  { %20 = dma.hbm_to_vmem [thread:$0]  %s873_s0, 256, %s18_s13, [#allocation3]  }
  0x13   :  { %s752_s28 = scalar_lea.hbm %s874_s1, 8192 }
  0x14   :  { %p753_p8 = scmp.ne.s32.totalorder %s874_s1, %s752_s28  ;;  %p756_p9 = scmp.lt.u32.totalorder %s752_s28, %s874_s1 }
  0x16   :  { %p758_p10 = pnand %p756_p9, %p753_p8 }
  0x18   :  { %761 = shalt.err (!%p758_p10)
}
  0x19   :  { %s762_s6 = scalar_lea.vmem %s827_s15, 8192  ;;  %p767_p12 = scmp.lt.s32.totalorder %s827_s15, %s827_s15 }
  0x1a   :  { %p763_p11 = scmp.ne.s32.totalorder %s827_s15, %s762_s6  ;;  %p768_p13 = scmp.lt.s32.totalorder %s762_s6, %s762_s6 }
  0x1c   :  { %p769_p0 = por %p768_p13, %p767_p12 }
  0x1e   :  { %p770_p1 = pnand %p769_p0, %p763_p11 }
  0x20   :  { %773 = shalt.err (!%p770_p1)
}
  0x21   :  { %s804_s0 = smov 128   ;;  %s805_s7 = smov 8  }
  0x22   :  { %32 = dma.hbm_to_vmem [thread:$0]  %s874_s1, 8192, %s827_s15, [#allocation6], %s804_s0, %s804_s0, %s805_s7  }
  0x23   :  { %796 = dma.done.wait [#allocation3], 256  }
  0x24   :  { %797 = vsyncadd [#allocation3], 4294967040 }
  0x25   :  { %798 = dma.done.wait [#allocation6], 8192  }
  0x26   :  { %799 = vsyncadd [#allocation6], 4294959104  ;;  %v630_v0 = vld [vmem:[#allocation5 + $0x4] ss:$8 sps:$4 sm:$0xff]   ;;  %v634_v2 = vld [vmem:[#allocation5] ss:$8 sps:$4 sm:$0xff]  }
  0x27   :  { %v632_v1 = vld [vmem:[#allocation5 + $0x104] ss:$8 sps:$4 sm:$0xff]   ;;  %453 = vmatprep.subr.bf16.mxu1 %v630_v0  ;;  %v635_v3 = vld [vmem:[#allocation5 + $0x100] ss:$8 sps:$4 sm:$0xff]   ;;  %v636_v4 = vld [vmem:[#allocation5 + $0x14] ss:$8 sps:$4 sm:$0xff]  }
  0x28   :  { %494 = vmatprep.subr.bf16.mxu0 %v632_v1  ;;  %454 = vmatpush1.bf16.msra.mxu1 %v634_v2  ;;  %v638_v5 = vld [vmem:[#allocation5 + $0x114] ss:$8 sps:$4 sm:$0xff]   ;;  %v640_v6 = vld [vmem:[#allocation5 + $0x10] ss:$8 sps:$4 sm:$0xff]   ;;  %v642_v8 = vld [vmem:[#allocation5 + $0x24] ss:$8 sps:$4 sm:$0xff]  }
  0x29   :  { %495 = vmatpush1.bf16.msra.mxu0 %v635_v3  ;;  %455 = vmatprep.subr.bf16.mxu1 %v636_v4  ;;  %v641_v7 = vld [vmem:[#allocation5 + $0x110] ss:$8 sps:$4 sm:$0xff]   ;;  %v644_v9 = vld [vmem:[#allocation5 + $0x124] ss:$8 sps:$4 sm:$0xff]   ;;  %v646_v10 = vld [vmem:[#allocation5 + $0x20] ss:$8 sps:$4 sm:$0xff]  }
  0x2a   :  { %496 = vmatprep.subr.bf16.mxu0 %v638_v5  ;;  %v647_v11 = vld [vmem:[#allocation5 + $0x120] ss:$8 sps:$4 sm:$0xff]   ;;  %v648_v12 = vld [vmem:[#allocation5 + $0x34] ss:$8 sps:$4 sm:$0xff]   ;;  %v652_v14 = vld [vmem:[#allocation5 + $0x30] ss:$8 sps:$4 sm:$0xff]  }
  0x2b   :  { %v650_v13 = vld [vmem:[#allocation5 + $0x134] ss:$8 sps:$4 sm:$0xff]   ;;  %v653_v15 = vld [vmem:[#allocation5 + $0x130] ss:$8 sps:$4 sm:$0xff]   ;;  %v654_v16 = vld [vmem:[#allocation5 + $0x44] ss:$8 sps:$4 sm:$0xff]  }
  0x2c   :  { %456 = vmatpush1.bf16.msra.mxu1 %v640_v6  ;;  %v656_v17 = vld [vmem:[#allocation5 + $0x144] ss:$8 sps:$4 sm:$0xff]   ;;  %v658_v18 = vld [vmem:[#allocation5 + $0x40] ss:$8 sps:$4 sm:$0xff]   ;;  %v660_v20 = vld [vmem:[#allocation5 + $0x54] ss:$8 sps:$4 sm:$0xff]   ;;  %v109_v6 = vlaneseq }
  0x2d   :  { %497 = vmatpush1.bf16.msra.mxu0 %v641_v7  ;;  %457 = vmatprep.subr.bf16.mxu1 %v642_v8  ;;  %v659_v19 = vld [vmem:[#allocation5 + $0x140] ss:$8 sps:$4 sm:$0xff]   ;;  %v662_v21 = vld [vmem:[#allocation5 + $0x154] ss:$8 sps:$4 sm:$0xff]   ;;  %v664_v22 = vld [vmem:[#allocation5 + $0x50] ss:$8 sps:$4 sm:$0xff]  }
  0x2e   :  { %498 = vmatprep.subr.bf16.mxu0 %v644_v9  ;;  %v665_v23 = vld [vmem:[#allocation5 + $0x150] ss:$8 sps:$4 sm:$0xff]   ;;  %v666_v24 = vld [vmem:[#allocation5 + $0x64] ss:$8 sps:$4 sm:$0xff]   ;;  %v670_v26 = vld [vmem:[#allocation5 + $0x60] ss:$8 sps:$4 sm:$0xff]  }
  0x2f   :  { %v668_v25 = vld [vmem:[#allocation5 + $0x164] ss:$8 sps:$4 sm:$0xff]   ;;  %v671_v27 = vld [vmem:[#allocation5 + $0x160] ss:$8 sps:$4 sm:$0xff]   ;;  %v672_v28 = vld [vmem:[#allocation5 + $0x74] ss:$8 sps:$4 sm:$0xff]  }
  0x30   :  { %458 = vmatpush1.bf16.msra.mxu1 %v646_v10  ;;  %v674_v29 = vld [vmem:[#allocation5 + $0x174] ss:$8 sps:$4 sm:$0xff]   ;;  %v676_v30 = vld [vmem:[#allocation5 + $0x70] ss:$8 sps:$4 sm:$0xff]   ;;  %v678_v32 = vld [vmem:[#allocation5 + $0x84] ss:$8 sps:$4 sm:$0xff]  }
  0x31   :  { %499 = vmatpush1.bf16.msra.mxu0 %v647_v11  ;;  %459 = vmatprep.subr.bf16.mxu1 %v648_v12  ;;  %v677_v31 = vld [vmem:[#allocation5 + $0x170] ss:$8 sps:$4 sm:$0xff]   ;;  %v680_v33 = vld [vmem:[#allocation5 + $0x184] ss:$8 sps:$4 sm:$0xff]   ;;  %v682_v34 = vld [vmem:[#allocation5 + $0x80] ss:$8 sps:$4 sm:$0xff]  }
  0x32   :  { %500 = vmatprep.subr.bf16.mxu0 %v650_v13  ;;  %v683_v35 = vld [vmem:[#allocation5 + $0x180] ss:$8 sps:$4 sm:$0xff]   ;;  %v684_v36 = vld [vmem:[#allocation5 + $0x94] ss:$8 sps:$4 sm:$0xff]   ;;  %v688_v38 = vld [vmem:[#allocation5 + $0x90] ss:$8 sps:$4 sm:$0xff]  }
  0x33   :  { %v686_v37 = vld [vmem:[#allocation5 + $0x194] ss:$8 sps:$4 sm:$0xff]   ;;  %v689_v39 = vld [vmem:[#allocation5 + $0x190] ss:$8 sps:$4 sm:$0xff]   ;;  %v690_v40 = vld [vmem:[#allocation5 + $0xa4] ss:$8 sps:$4 sm:$0xff]  }
  0x34   :  { %460 = vmatpush1.bf16.msra.mxu1 %v652_v14  ;;  %v692_v41 = vld [vmem:[#allocation5 + $0x1a4] ss:$8 sps:$4 sm:$0xff]   ;;  %v694_v42 = vld [vmem:[#allocation5 + $0xa0] ss:$8 sps:$4 sm:$0xff]   ;;  %v696_v44 = vld [vmem:[#allocation5 + $0xb4] ss:$8 sps:$4 sm:$0xff]  }
  0x35   :  { %501 = vmatpush1.bf16.msra.mxu0 %v653_v15  ;;  %461 = vmatprep.subr.bf16.mxu1 %v654_v16  ;;  %v695_v43 = vld [vmem:[#allocation5 + $0x1a0] ss:$8 sps:$4 sm:$0xff]   ;;  %v698_v45 = vld [vmem:[#allocation5 + $0x1b4] ss:$8 sps:$4 sm:$0xff]   ;;  %v700_v49 = vld [vmem:[#allocation5 + $0xb0] ss:$8 sps:$4 sm:$0xff]  }
  0x36   :  { %502 = vmatprep.subr.bf16.mxu0 %v656_v17  ;;  %v41_v46 = vld [vmem:[#allocation2] sm:$0xff]  ;;  %v42_v48 = vld [vmem:[#allocation2 + $0x8] sm:$0xff]  ;;  %v702_v52 = vld [vmem:[#allocation5 + $0xc4] ss:$8 sps:$4 sm:$0xff]   ;;  %v110_v7 = vshrl.u32 %v109_v6, 7  ;;  %s806_s11 = smov [#allocation7]  }
  0x37   :  { %v554_v47 = vcombine.high %v41_v46, %v41_v46  ;;  %v701_v50 = vld [vmem:[#allocation5 + $0x1b0] ss:$8 sps:$4 sm:$0xff]   ;;  %v556_v51 = vcombine.high %v42_v48, %v42_v48  ;;  %v704_v53 = vld [vmem:[#allocation5 + $0x1c4] ss:$8 sps:$4 sm:$0xff]   ;;  %v706_v54 = vld [vmem:[#allocation5 + $0xc0] ss:$8 sps:$4 sm:$0xff]   ;;  %v553_v4 = vcombine.low %v41_v46, %v41_v46  ;;  %v555_v5 = vcombine.low %v42_v48, %v42_v48 }
  0x38   :  { %462 = vmatpush1.bf16.msra.mxu1 %v658_v18  ;;  %v707_v55 = vld [vmem:[#allocation5 + $0x1c0] ss:$8 sps:$4 sm:$0xff]   ;;  %v708_v56 = vld [vmem:[#allocation5 + $0xd4] ss:$8 sps:$4 sm:$0xff]   ;;  %v712_v58 = vld [vmem:[#allocation5 + $0xd0] ss:$8 sps:$4 sm:$0xff]  }
  0x39   :  { %503 = vmatpush1.bf16.msra.mxu0 %v659_v19  ;;  %463 = vmatprep.subr.bf16.mxu1 %v660_v20  ;;  %v710_v57 = vld [vmem:[#allocation5 + $0x1d4] ss:$8 sps:$4 sm:$0xff]   ;;  %v713_v59 = vld [vmem:[#allocation5 + $0x1d0] ss:$8 sps:$4 sm:$0xff]   ;;  %v714_v60 = vld [vmem:[#allocation5 + $0xe4] ss:$8 sps:$4 sm:$0xff]  }
  0x3a   :  { %504 = vmatprep.subr.bf16.mxu0 %v662_v21  ;;  %485 = vmatprep.mubr.bf16.mxu1 %v554_v47  ;;  %v716_v61 = vld [vmem:[#allocation5 + $0x1e4] ss:$8 sps:$4 sm:$0xff]   ;;  %v718_v62 = vld [vmem:[#allocation5 + $0xe0] ss:$8 sps:$4 sm:$0xff]   ;;  %v720_v0 = vld [vmem:[#allocation5 + $0xf4] ss:$8 sps:$4 sm:$0xff]  }
  0x3b   :  { %526 = vmatprep.mubr.bf16.mxu0 %v556_v51  ;;  %v719_v63 = vld [vmem:[#allocation5 + $0x1e0] ss:$8 sps:$4 sm:$0xff]   ;;  %v722_v1 = vld [vmem:[#allocation5 + $0x1f4] ss:$8 sps:$4 sm:$0xff]   ;;  %v724_v2 = vld [vmem:[#allocation5 + $0xf0] ss:$8 sps:$4 sm:$0xff]  }
  0x3c   :  { %464 = vmatpush1.bf16.msra.mxu1 %v664_v22  ;;  %v725_v3 = vld [vmem:[#allocation5 + $0x1f0] ss:$8 sps:$4 sm:$0xff]   ;;  %v111_v8 = vsub.s32 0, %v110_v7  ;;  %v115_v10 = vsub.s32 1, %v110_v7  ;;  %s543_s12 = sshll.u32 %s806_s11, 4  ;;  %s544_s12 = int_to_ptr.vmem [resolvable:$true] %s543_s12 }
  0x3d   :  { %505 = vmatpush1.bf16.msra.mxu0 %v665_v23  ;;  %465 = vmatprep.subr.bf16.mxu1 %v666_v24  ;;  %v107_v9 = vld [vmem:[%s875_s2] sm:$0x3]  ;;  %s774_s2 = scalar_lea.vmem %s544_s12, 256  ;;  %p779_p3 = scmp.lt.s32.totalorder %s544_s12, %s544_s12 }
  0x3e   :  { %506 = vmatprep.subr.bf16.mxu0 %v668_v25  ;;  %v112_v11 = vrot.slane %v107_v9, %v111_v8  ;;  %v116_v12 = vrot.slane %v107_v9, %v115_v10  ;;  %p775_p2 = scmp.ne.s32.totalorder %s544_s12, %s774_s2  ;;  %p780_p4 = scmp.lt.s32.totalorder %s774_s2, %s774_s2 }
  0x40   :  { %466 = vmatpush1.bf16.msra.mxu1 %v670_v26  ;;  %p781_p5 = por %p780_p4, %p779_p3 }
  0x41   :  { %507 = vmatpush1.bf16.msra.mxu0 %v671_v27  ;;  %467 = vmatprep.subr.bf16.mxu1 %v672_v28 }
  0x42   :  { %508 = vmatprep.subr.bf16.mxu0 %v674_v29  ;;  %p782_p6 = pnand %p781_p5, %p775_p2 }
  0x44   :  { %468 = vmatpush1.bf16.msra.mxu1 %v676_v30 }
  0x45   :  { %509 = vmatpush1.bf16.msra.mxu0 %v677_v31  ;;  %469 = vmatprep.subr.bf16.mxu1 %v678_v32 }
  0x46   :  { %510 = vmatprep.subr.bf16.mxu0 %v680_v33 }
  0x48   :  { %470 = vmatpush1.bf16.msra.mxu1 %v682_v34 }
  0x49   :  { %511 = vmatpush1.bf16.msra.mxu0 %v683_v35  ;;  %471 = vmatprep.subr.bf16.mxu1 %v684_v36 }
  0x4a   :  { %512 = vmatprep.subr.bf16.mxu0 %v686_v37 }
  0x4c   :  { %472 = vmatpush1.bf16.msra.mxu1 %v688_v38 }
  0x4d   :  { %513 = vmatpush1.bf16.msra.mxu0 %v689_v39  ;;  %473 = vmatprep.subr.bf16.mxu1 %v690_v40 }
  0x4e   :  { %514 = vmatprep.subr.bf16.mxu0 %v692_v41 }
  0x50   :  { %474 = vmatpush1.bf16.msra.mxu1 %v694_v42 }
  0x51   :  { %515 = vmatpush1.bf16.msra.mxu0 %v695_v43  ;;  %475 = vmatprep.subr.bf16.mxu1 %v696_v44 }
  0x52   :  { %516 = vmatprep.subr.bf16.mxu0 %v698_v45 }
  0x54   :  { %476 = vmatpush1.bf16.msra.mxu1 %v700_v49 }
  0x55   :  { %517 = vmatpush1.bf16.msra.mxu0 %v701_v50  ;;  %477 = vmatprep.subr.bf16.mxu1 %v702_v52 }
  0x56   :  { %518 = vmatprep.subr.bf16.mxu0 %v704_v53 }
  0x58   :  { %478 = vmatpush1.bf16.msra.mxu1 %v706_v54 }
  0x59   :  { %519 = vmatpush1.bf16.msra.mxu0 %v707_v55  ;;  %479 = vmatprep.subr.bf16.mxu1 %v708_v56 }
  0x5a   :  { %520 = vmatprep.subr.bf16.mxu0 %v710_v57 }
  0x5c   :  { %480 = vmatpush1.bf16.msra.mxu1 %v712_v58 }
  0x5d   :  { %521 = vmatpush1.bf16.msra.mxu0 %v713_v59  ;;  %481 = vmatprep.subr.bf16.mxu1 %v714_v60 }
  0x5e   :  { %522 = vmatprep.subr.bf16.mxu0 %v716_v61 }
  0x60   :  { %482 = vmatpush1.bf16.msra.mxu1 %v718_v62 }
  0x61   :  { %523 = vmatpush1.bf16.msra.mxu0 %v719_v63  ;;  %483 = vmatprep.subr.bf16.mxu1 %v720_v0 }
  0x62   :  { %524 = vmatprep.subr.bf16.mxu0 %v722_v1 }
  0x64   :  { %484 = vmatpush1.bf16.msra.mxu1 %v724_v2 }
  0x65   :  { %525 = vmatpush1.bf16.msra.mxu0 %v725_v3 }
  0x67   :  { %486 = vmatmul.mubr.bf16.vlgmr.msra.gmra.mrb[0].mxu1 %v553_v4 }
  0x68   :  { %527 = vmatmul.mubr.bf16.vlgmr.msra.gmra.mrb[0].mxu0 %v555_v5 }
 0x13a   :  { %v487_v13 = vpop.f32.mrb[0].mxu1 }
 0x13b   :  { %v528_v14 = vpop.f32.mrb[0].mxu0  ;;  %v488_v15 = vadd.f32 %v487_v13, %v112_v11  ;;  %v489_v16 = vpop.f32.mrb[1].mxu1 }
 0x13c   :  { %v530_v17 = vpop.f32.mrb[1].mxu0  ;;  %v490_v18 = vadd.f32 %v489_v16, %v116_v12  ;;  %v491_v19 = vpop.f32.mrb[2].mxu1 }
 0x13d   :  { %v532_v20 = vpop.f32.mrb[2].mxu0  ;;  %v529_v21 = vadd.f32 %v528_v14, %v488_v15  ;;  %v492_v22 = vpop.f32.mrb[3].mxu1 }
 0x13e   :  { %v533_v23 = vpop.f32.mrb[3].mxu0  ;;  %v531_v24 = vadd.f32 %v530_v17, %v490_v18 }
 0x13f   :  { %535 = vst [vmem:[#allocation7] sm:$0xff] %v529_v21 }
 0x140   :  { %536 = vst [vmem:[#allocation7 + $0x8] sm:$0xff] %v531_v24 }
 0x141   :  { %785 = shalt.err (!%p782_p6)
}
 0x142   :  { %s786_s15 = scalar_lea.hbm %s876_s3, 256 }
 0x143   :  { %p787_p7 = scmp.ne.s32.totalorder %s876_s3, %s786_s15  ;;  %p790_p8 = scmp.lt.u32.totalorder %s786_s15, %s876_s3 }
 0x145   :  { %p792_p9 = pnand %p790_p8, %p787_p7 }
 0x147   :  { %795 = shalt.err (!%p792_p9)
}
 0x148   :  { %546 = dma.vmem_to_hbm [thread:$0]  %s544_s12, 256, %s876_s3, [#allocation4]  }
 0x149   :  { %800 = dma.done.wait [#allocation4], 256  }
 0x14a   :  { %801 = vsyncadd [#allocation4], 4294967040 }
 0x14b   :  { %550 = vsyncpa [#allocation3], 1 }
 0x14c   :  { %551 = vsyncpa [#allocation6], 1 }
 0x14d   :  { %552 = vsyncpa [#allocation4], 1 }

</bundles_post_ra>
